<compile_context>
chip_gen: v7x
topology: tpu7x:2x2x1
jax: 0.10.0
libtpu: 0.0.40
codegen_flags: <defaults>
</compile_context>

<pallas_src>
import functools

import jax
import jax.numpy as jnp
from jax import lax
from jax.experimental import pallas as pl
from jax.experimental.pallas import tpu as pltpu


def _round_up(x, m):
    return ((x + m - 1) // m) * m


def _direct_norm_loss_kernel(lab_ref, s_ref, t_ref, etab_ref, o_ref, *,
                             tb, batch, num_class, dim):
    # Blocks: labels (1, TB) int32 lane-major, s/t (TB, D), etab (NC, D) resident
    # unit-norm class centers, o (1, 8, 128) lane-dense partial-sum tile.
    s = s_ref[...].astype(jnp.float32)
    t = t_ref[...].astype(jnp.float32)
    etab = etab_ref[...]                                            # (NC, D) f32

    # In-kernel class-center gather.  one_hot is built transposed (NC, TB) from
    # the lane-major labels and contracted over the class/sublane dim on the MXU
    # (einsum 'ct,cd->td') -> centers (TB, D), already unit-norm.
    labels = lab_ref[...]                                           # (1, TB)
    classes = lax.broadcasted_iota(jnp.int32, (num_class, 1), 0)    # (NC, 1)
    one_hot_t = (classes == labels).astype(jnp.float32)             # (NC, TB)
    centers = lax.dot_general(
        one_hot_t, etab,
        dimension_numbers=(((0,), (0,)), ((), ())),
        preferred_element_type=jnp.float32)                         # (TB, D)

    # Row-wise reductions on the MXU (all-ones RHS) instead of XLU lane-reduces.
    ones_mat = jnp.ones((dim, 128), jnp.float32)

    def _row_sum(x):
        return jnp.dot(x, ones_mat, preferred_element_type=jnp.float32)[:, :1]

    s_sq = _row_sum(s * s)                                          # (TB, 1)
    t_sq = _row_sum(t * t)
    dot_se = _row_sum(s * centers)

    # loss_i = 1 - dot(s_i, e_c) / max(||s_i||, ||t_i||)   (e_c is unit-norm).
    max_sq = jnp.maximum(jnp.maximum(s_sq, t_sq), 1e-30)            # eps: avoid inf
    per_sample = 1.0 - dot_se * lax.rsqrt(max_sq)                   # (TB, 1)

    # Mask padded rows of a partial last tile (keeps garbage/NaN out of the sum).
    row = pl.program_id(0) * tb + lax.broadcasted_iota(jnp.int32, (tb, 1), 0)
    per_sample = jnp.where(row < batch, per_sample, 0.0)

    # Lane-dense partial-sum tile for this grid step.
    o_ref[...] = jnp.full(o_ref.shape, jnp.sum(per_sample), o_ref.dtype)


def _vmem_budget_bytes():
    # Per-generation scoped-VMEM budget: ~half of physical VMEM per TensorCore
    # (v5e/v6e: 128 MiB -> 64 MiB; v7x: 64 MiB -> 32 MiB).  Conservative fallback
    # (v7x-safe) if the hardware query is unavailable at trace time.
    try:
        cap = int(pltpu.get_tpu_info().vmem_capacity_bytes)
    except Exception:
        cap = 64 << 20
    return int(max(16 << 20, min(cap // 2, 64 << 20)))


def _fixed_vmem_bytes(D, num_class):
    nc_pad = _round_up(num_class, 8)
    d_pad = _round_up(D, 128)
    return (nc_pad * d_pad * 4            # resident normalized class-center table
            + _round_up(D, 8) * 128 * 4   # all-ones MXU row-sum RHS
            + 2 * 8 * 128 * 4             # double-buffered output partial tiles
            + (2 << 20))                  # compiler scratch / misc headroom


def _vmem_bytes_per_row(D, itemsize, num_class):
    nc_pad = _round_up(num_class, 8)
    d_pad = _round_up(D, 128)
    return (2 * 2 * d_pad * itemsize      # s, t input tiles, double-buffered
            + 2 * 4                       # lane-major label tiles, double-buffered
            + 4 * d_pad * 4               # f32 working set: casts/products + centers
            + nc_pad * 4                  # transposed one-hot column
            + 6 * 128 * 4)                # per-row scalars / MXU row-sum results


def _choose_batch_tile(B, D, itemsize, num_class, budget):
    avail = budget - _fixed_vmem_bytes(D, num_class)
    per_row = _vmem_bytes_per_row(D, itemsize, num_class)
    tb = max(8, (avail // per_row) // 8 * 8)
    # Keep the grid at >= 4 steps so the BlockSpec pipeline actually overlaps
    # DMA/compute and both v7x TensorCores get work under ("parallel",).
    tb = min(tb, max(8, _round_up(pl.cdiv(B, 4), 8)))
    return int(tb)


def direct_norm_loss(s_emb, t_emb, t_emb_table, labels, nd_weight=1.0):
    """s_emb, t_emb: (B, D); t_emb_table: (num_class, D); labels: (B,) int."""
    assert s_emb.shape == t_emb.shape
    B, D = s_emb.shape
    num_class, tab_d = t_emb_table.shape
    assert tab_d == D
    assert labels.shape == (B,)

    # Normalize the class-center table once here (NC x D is tiny); the kernel then
    # never touches the center norms again.
    tab = t_emb_table.astype(jnp.float32)
    e_tab = tab / jnp.maximum(jnp.linalg.norm(tab, axis=-1, keepdims=True), 1e-30)

    itemsize = jnp.dtype(s_emb.dtype).itemsize
    budget = _vmem_budget_bytes()
    TB = _choose_batch_tile(B, D, itemsize, num_class, budget)
    num_blocks = pl.cdiv(B, TB)

    # Labels go in lane-major: (num_blocks, TB) with (1, TB) blocks.
    padded_b = num_blocks * TB
    labels_i32 = labels.astype(jnp.int32)
    if padded_b != B:
        labels_i32 = jnp.pad(labels_i32, (0, padded_b - B))
    labels2d = labels_i32.reshape(num_blocks, TB)

    kernel = functools.partial(
        _direct_norm_loss_kernel, tb=TB, batch=B, num_class=num_class, dim=D)

    partials = pl.pallas_call(
        kernel,
        out_shape=jax.ShapeDtypeStruct((num_blocks, 8, 128), jnp.float32),
        grid_spec=pltpu.PrefetchScalarGridSpec(
            num_scalar_prefetch=0,
            grid=(num_blocks,),
            in_specs=[
                pl.BlockSpec((1, TB), lambda i: (i, 0)),            # labels (lane-major)
                pl.BlockSpec((TB, D), lambda i: (i, 0)),            # student embeddings
                pl.BlockSpec((TB, D), lambda i: (i, 0)),            # teacher embeddings
                pl.BlockSpec((num_class, D), lambda i: (0, 0)),     # unit-norm class table
            ],
            out_specs=pl.BlockSpec((1, 8, 128), lambda i: (i, 0, 0)),
        ),
        compiler_params=pltpu.CompilerParams(
            dimension_semantics=("parallel",),
            vmem_limit_bytes=budget),
    )(labels2d, s_emb, t_emb, e_tab)

    total = jnp.sum(partials[:, 0, 0])
    return total * nd_weight / B


def _reference(s_emb, t_emb, t_emb_table, labels, nd_weight=1.0):
    centers = jnp.take(t_emb_table, labels, axis=0)
    e_c = centers / jnp.linalg.norm(centers, axis=-1, keepdims=True)
    s_norm = jnp.linalg.norm(s_emb, axis=-1)
    t_norm = jnp.linalg.norm(t_emb, axis=-1)
    max_norm = jnp.maximum(s_norm, t_norm)
    dots = jnp.sum(s_emb * e_c, axis=-1)
    loss = jnp.sum(1.0 - dots / max_norm) * nd_weight
    return loss / s_emb.shape[0]


if __name__ == "__main__":
    num_class = 81
    nd_weight = 1.0
    B, D = 8, 32

    key = jax.random.PRNGKey(0)
    k_s, k_t, k_tab, k_lab = jax.random.split(key, 4)

    s_emb = jax.random.normal(k_s, (B, D), dtype=jnp.float32)
    t_emb = jax.random.normal(k_t, (B, D), dtype=jnp.float32)
    # Deterministic synthetic class-center table (stands in for the T_EMB dict).
    t_emb_table = jax.random.normal(k_tab, (num_class, D), dtype=jnp.float32)
    labels = jax.random.randint(k_lab, (B,), 0, num_class, dtype=jnp.int32)

    out = direct_norm_loss(s_emb, t_emb, t_emb_table, labels, nd_weight)
    out = jax.block_until_ready(out)

    ref = _reference(s_emb, t_emb, t_emb_table, labels, nd_weight)
    assert jnp.allclose(out, ref, rtol=1e-5, atol=1e-5), (out, ref)

    print("KERNEL_OK")
</pallas_src>

<mosaic_0001>
module attributes {stable_mosaic.version = 11 : i64} {
  func.func @_direct_norm_loss_kernel(%arg0: i32, %arg1: memref<1x8xi32, #tpu.memory_space<vmem>>, %arg2: memref<8x32xf32, #tpu.memory_space<vmem>>, %arg3: memref<8x32xf32, #tpu.memory_space<vmem>>, %arg4: memref<81x32xf32, #tpu.memory_space<vmem>>, %arg5: memref<1x8x128xf32, #tpu.memory_space<vmem>>) attributes {dimension_semantics = [#tpu.dimension_semantics<parallel>], iteration_bounds = array<i64: 1>, scalar_prefetch = 0 : i64, scratch_operands = 0 : i64, tpu.core_type = #tpu.core_type<tc>, window_params = [{transform_indices = @transform_0, window_bounds = array<i64: 1, 8>}, {transform_indices = @transform_1, window_bounds = array<i64: 8, 32>}, {transform_indices = @transform_2, window_bounds = array<i64: 8, 32>}, {pipeline_mode = #tpu.pipeline_mode<synchronous>, transform_indices = @transform_3, window_bounds = array<i64: 81, 32>}, {transform_indices = @transform_4, window_bounds = array<i64: 1, 8, 128>}]} {
    %c0 = arith.constant 0 : index
    %c0_0 = arith.constant 0 : index
    %0 = vector.load %arg2[%c0, %c0_0] : memref<8x32xf32, #tpu.memory_space<vmem>>, vector<8x32xf32>
    %c0_1 = arith.constant 0 : index
    %c0_2 = arith.constant 0 : index
    %1 = vector.load %arg3[%c0_1, %c0_2] : memref<8x32xf32, #tpu.memory_space<vmem>>, vector<8x32xf32>
    %c0_3 = arith.constant 0 : index
    %c0_4 = arith.constant 0 : index
    %2 = vector.load %arg4[%c0_3, %c0_4] : memref<81x32xf32, #tpu.memory_space<vmem>>, vector<81x32xf32>
    %c0_5 = arith.constant 0 : index
    %c0_6 = arith.constant 0 : index
    %3 = vector.load %arg1[%c0_5, %c0_6] : memref<1x8xi32, #tpu.memory_space<vmem>>, vector<1x8xi32>
    %4 = tpu.iota {dimensions = array<i32: 0>} : vector<81x1xi32>
    %5 = vector.broadcast %4 : vector<81x1xi32> to vector<81x8xi32>
    %6 = vector.broadcast %3 : vector<1x8xi32> to vector<81x8xi32>
    %7 = arith.cmpi eq, %5, %6 : vector<81x8xi32>
    %8 = arith.extui %7 : vector<81x8xi1> to vector<81x8xi32>
    %9 = arith.sitofp %8 : vector<81x8xi32> to vector<81x8xf32>
    %cst = arith.constant dense<0.000000e+00> : vector<8x32xf32>
    %10 = tpu.matmul %9, %2, %cst {dimension_numbers = #tpu.dot_dimension_numbers<[0], [0], [1], [1], [0, 1, 1, 1], [], []>} : vector<81x8xf32>, vector<81x32xf32>, vector<8x32xf32> -> vector<8x32xf32>
    %cst_7 = arith.constant 1.000000e+00 : f32
    %11 = vector.broadcast %cst_7 : f32 to vector<32x128xf32>
    %12 = arith.mulf %0, %0 : vector<8x32xf32>
    %cst_8 = arith.constant dense<0.000000e+00> : vector<8x128xf32>
    %13 = tpu.matmul %12, %11, %cst_8 {dimension_numbers = #tpu.dot_dimension_numbers<[1], [0], [0], [1], [0, 0, 1, 1], [], []>} : vector<8x32xf32>, vector<32x128xf32>, vector<8x128xf32> -> vector<8x128xf32>
    %14 = vector.extract_strided_slice %13 {offsets = [0, 0], sizes = [8, 1], strides = [1, 1]} : vector<8x128xf32> to vector<8x1xf32>
    %15 = arith.mulf %1, %1 : vector<8x32xf32>
    %cst_9 = arith.constant dense<0.000000e+00> : vector<8x128xf32>
    %16 = tpu.matmul %15, %11, %cst_9 {dimension_numbers = #tpu.dot_dimension_numbers<[1], [0], [0], [1], [0, 0, 1, 1], [], []>} : vector<8x32xf32>, vector<32x128xf32>, vector<8x128xf32> -> vector<8x128xf32>
    %17 = vector.extract_strided_slice %16 {offsets = [0, 0], sizes = [8, 1], strides = [1, 1]} : vector<8x128xf32> to vector<8x1xf32>
    %18 = arith.mulf %0, %10 : vector<8x32xf32>
    %cst_10 = arith.constant dense<0.000000e+00> : vector<8x128xf32>
    %19 = tpu.matmul %18, %11, %cst_10 {dimension_numbers = #tpu.dot_dimension_numbers<[1], [0], [0], [1], [0, 0, 1, 1], [], []>} : vector<8x32xf32>, vector<32x128xf32>, vector<8x128xf32> -> vector<8x128xf32>
    %20 = vector.extract_strided_slice %19 {offsets = [0, 0], sizes = [8, 1], strides = [1, 1]} : vector<8x128xf32> to vector<8x1xf32>
    %21 = arith.maximumf %14, %17 : vector<8x1xf32>
    %cst_11 = arith.constant 1.000000e-30 : f32
    %22 = vector.broadcast %cst_11 : f32 to vector<8x1xf32>
    %23 = arith.maximumf %21, %22 : vector<8x1xf32>
    %24 = math.rsqrt %23 : vector<8x1xf32>
    %25 = arith.mulf %20, %24 : vector<8x1xf32>
    %cst_12 = arith.constant 1.000000e+00 : f32
    %26 = vector.broadcast %cst_12 : f32 to vector<8x1xf32>
    %27 = arith.subf %26, %25 : vector<8x1xf32>
    %c8_i32 = arith.constant 8 : i32
    %28 = arith.muli %arg0, %c8_i32 : i32
    %29 = tpu.iota {dimensions = array<i32: 0>} : vector<8x1xi32>
    %30 = vector.broadcast %28 : i32 to vector<8x1xi32>
    %31 = arith.addi %30, %29 : vector<8x1xi32>
    %c8_i32_13 = arith.constant 8 : i32
    %32 = vector.broadcast %c8_i32_13 : i32 to vector<8x1xi32>
    %33 = arith.cmpi slt, %31, %32 : vector<8x1xi32>
    %cst_14 = arith.constant 0.000000e+00 : f32
    %34 = vector.broadcast %cst_14 : f32 to vector<8x1xf32>
    %35 = arith.select %33, %27, %34 : vector<8x1xi1>, vector<8x1xf32>
    %36 = vector.shape_cast %35 : vector<8x1xf32> to vector<1x8x1xf32>
    %cst_15 = arith.constant dense<0.000000e+00> : vector<1xf32>
    %37 = vector.multi_reduction <add>, %36, %cst_15 [1, 2] : vector<1x8x1xf32> to vector<1xf32>
    %38 = vector.shape_cast %37 : vector<1xf32> to vector<1x1x1xf32>
    %39 = vector.extract %38[0, 0, 0] : f32 from vector<1x1x1xf32>
    %40 = vector.broadcast %39 : f32 to vector<1x8x128xf32>
    %c0_16 = arith.constant 0 : index
    %c0_17 = arith.constant 0 : index
    %c0_18 = arith.constant 0 : index
    %41 = vector.load %arg5[%c0_16, %c0_17, %c0_18] : memref<1x8x128xf32, #tpu.memory_space<vmem>>, vector<1x8x128xf32>
    tpu.vector_store %arg5[%c0_16, %c0_17, %c0_18], %40 {strides = array<i32>} : memref<1x8x128xf32, #tpu.memory_space<vmem>>, vector<1x8x128xf32>,
    return
  }
  func.func @transform_0(%arg0: i32) -> (i32, i32) {
    %c0_i32 = arith.constant 0 : i32
    %c0_i32_0 = arith.constant 0 : i32
    return %arg0, %c0_i32 : i32, i32
  }
  func.func @transform_1(%arg0: i32) -> (i32, i32) {
    %c0_i32 = arith.constant 0 : i32
    %c0_i32_0 = arith.constant 0 : i32
    return %arg0, %c0_i32 : i32, i32
  }
  func.func @transform_2(%arg0: i32) -> (i32, i32) {
    %c0_i32 = arith.constant 0 : i32
    %c0_i32_0 = arith.constant 0 : i32
    return %arg0, %c0_i32 : i32, i32
  }
  func.func @transform_3(%arg0: i32) -> (i32, i32) {
    %c0_i32 = arith.constant 0 : i32
    %c0_i32_0 = arith.constant 0 : i32
    %c0_i32_1 = arith.constant 0 : i32
    return %c0_i32, %c0_i32_0 : i32, i32
  }
  func.func @transform_4(%arg0: i32) -> (i32, i32, i32) {
    %c0_i32 = arith.constant 0 : i32
    %c0_i32_0 = arith.constant 0 : i32
    %c0_i32_1 = arith.constant 0 : i32
    return %arg0, %c0_i32, %c0_i32_0 : i32, i32, i32
  }
}

</mosaic_0001>

<bundles_post_ra>
// kernel: tpu_custom_call.1
= control target key start
LH: loop header
LB: loop body
LE: loop exit
PB: predicated region body
PF: predicated region fallthrough
CT: control target
= control target key end

     0   :  { %v32_v0 = vlaneseq  ;;  %v613_v4 = vmov 0.0|0.0   ;;  %vm614_vm0 = vmmov 0   ;;  %v615_v9 = vmov 0.0   ;;  %s762_s0 = inlined_call_operand.vmem [shape: s32[1,8], index: 0, kind: input, shape index: {}]   ;;  %s763_s1 = inlined_call_operand.vmem [shape: f32[8,32], index: 1, kind: input, shape index: {}]   ;;  %s764_s2 = inlined_call_operand.vmem [shape: f32[8,32], index: 2, kind: input, shape index: {}]   ;;  %s765_s3 = inlined_call_operand.vmem [shape: f32[81,32], index: 3, kind: input, shape index: {}]   ;;  %s766_s4 = inlined_call_operand.hbm [shape: f32[1,8,128], index: 4, kind: output, shape index: {}]  }
   0x1   :  { %v20_v1 = vld [vmem:[%s765_s3] sm:$0xff]  ;;  %v21_v2 = vld [vmem:[%s765_s3 + $0x8] sm:$0xff]  ;;  %553 = vmatprep.subr.bf16.mxu0 %v613_v4  ;;  %v22_v6 = vld [vmem:[%s765_s3 + $0x10] sm:$0xff]  ;;  %568 = vmatprep.subr.bf16.mxu1 %v613_v4 }
   0x2   :  { %v652_v3 = vld [vmem:[%s762_s0] ss:$0 sm:$0xff]  ;;  %v554_v5 = vpack.c.bf16 %v21_v2, %v20_v1  ;;  %v23_v7 = vld [vmem:[%s765_s3 + $0x18] sm:$0xff]  ;;  %v662_v8 = vshrl.u32 %v32_v0, 7  ;;  %517 = vmatprep.mubr.msk.f32.mxu0 %vm614_vm0, %v615_v9  ;;  %528 = vmatprep.mubr.msk.f32.mxu1 %vm614_vm0, %v615_v9 }
   0x3   :  { %v557_v10 = vpack.c.bf16 %v23_v7, %v22_v6 }
   0x4   :  { %555 = vmatpush3.bf16.msra.mxu0 %v554_v5 }
   0x5   :  { %9 = vsyncpa [#allocation3], 0  ;;  %vm48_vm1 = vcmp.eq.s32.totalorder %v662_v8, %v652_v3  ;;  %v34_v11 = vadd.s32 8, %v662_v8  ;;  %v35_v12 = vadd.s32 16, %v662_v8  ;;  %556 = vmatprep.subr.bf16.mxu0 %v613_v4  ;;  %v24_v13 = vld [vmem:[%s765_s3 + $0x20] sm:$0xff]  ;;  %v25_v14 = vld [vmem:[%s765_s3 + $0x28] sm:$0xff] }
   0x6   :  { %v452_v15 = vsel %vm48_vm1, 1.0, %v615_v9  ;;  %v560_v17 = vpack.c.bf16 %v25_v14, %v24_v13  ;;  %v36_v18 = vadd.s32 24, %v662_v8  ;;  %v26_v19 = vld [vmem:[%s765_s3 + $0x30] sm:$0xff]  ;;  %v27_v20 = vld [vmem:[%s765_s3 + $0x38] sm:$0xff]  ;;  %v37_v23 = vadd.s32 32, %v662_v8  ;;  %v28_v24 = vld [vmem:[%s765_s3 + $0x40] sm:$0xff] }
   0x7   :  { %81 = vxpose.xlu0.b32.start [1/11] (short) (narrow) %v452_v15, 8  ;;  %vm49_vm2 = vcmp.eq.s32.totalorder %v34_v11, %v652_v3  ;;  %vm50_vm3 = vcmp.eq.s32.totalorder %v35_v12, %v652_v3  ;;  %v563_v22 = vpack.c.bf16 %v27_v20, %v26_v19  ;;  %v29_v25 = vld [vmem:[%s765_s3 + $0x48] sm:$0xff]  ;;  %v616_v26 = vmov 1.0|1.0   ;;  %v704_v27 = vld [vmem:[%s763_s1] sm:$0xff] }
   0x8   :  { %v453_v16 = vsel %vm49_vm2, 1.0, %v615_v9  ;;  %558 = vmatpush3.bf16.msra.mxu0 %v557_v10  ;;  %v454_v21 = vsel %vm50_vm3, 1.0, %v615_v9  ;;  %vm51_vm4 = vcmp.eq.s32.totalorder %v36_v18, %v652_v3  ;;  %569 = vmatpush3.bf16.msra.mxu1 %v616_v26  ;;  %v566_v29 = vpack.c.bf16 %v29_v25, %v28_v24  ;;  %v30_v34 = vld [vmem:[%s765_s3 + $0x50] sm:$0x1]  ;;  %v19_v35 = vld [vmem:[%s764_s2] sm:$0xff]  ;;  %s617_s2 = smov [#allocation2]  }
   0x9   :  { %559 = vmatprep.subr.bf16.mxu0 %v613_v4  ;;  %570 = vmatprep.subr.bf16.mxu1 %v613_v4  ;;  %v455_v28 = vsel %vm51_vm4, 1.0, %v615_v9  ;;  %v191_v30 = vmul.f32 %v704_v27, %v704_v27  ;;  %vm52_vm5 = vcmp.eq.s32.totalorder %v37_v23, %v652_v3  ;;  %v38_v31 = vadd.s32 40, %v662_v8  ;;  %s443_s3 = sshll.u32 %s617_s2, 4  ;;  %s444_s3 = int_to_ptr.vmem [resolvable:$true] %s443_s3 }
   0xa   :  { %vm192_vm6 = vcmask 261120   ;;  %v456_v32 = vsel %vm52_vm5, 1.0, %v615_v9  ;;  %v39_v33 = vadd.s32 48, %v662_v8  ;;  %vm117_vm8 = vcmask 1040384   ;;  %s589_s16 = scalar_lea.vmem %s444_s3, 128  ;;  %p594_p1 = scmp.lt.s32.totalorder %s444_s3, %s444_s3 }
   0xb   :  { %82 = vxpose.xlu0.b32.cont [2/11] (short) (narrow) %v453_v16, 8  ;;  %vm53_vm7 = vcmp.eq.s32.totalorder %v38_v31, %v652_v3  ;;  %v266_v37 = vmul.f32 %v19_v35, %v19_v35  ;;  %v40_v38 = vadd.s32 56, %v662_v8  ;;  %v41_v40 = vadd.s32 64, %v662_v8  ;;  %p590_p0 = scmp.ne.s32.totalorder %s444_s3, %s589_s16  ;;  %p595_p2 = scmp.lt.s32.totalorder %s589_s16, %s589_s16 }
   0xc   :  { %561 = vmatpush3.bf16.msra.mxu0 %v560_v17  ;;  %571 = vmatpush3.bf16.msra.mxu1 %v616_v26  ;;  %v457_v36 = vsel %vm53_vm7, 1.0, %v615_v9  ;;  %vm54_vm9 = vcmp.eq.s32.totalorder %v39_v33, %v652_v3  ;;  %v42_v42 = vadd.s32 72, %v662_v8  ;;  %v43_v44 = vadd.s32 80, %v662_v8 }
   0xd   :  { %562 = vmatprep.subr.bf16.mxu0 %v613_v4  ;;  %572 = vmatprep.subr.bf16.mxu1 %v613_v4  ;;  %v458_v39 = vsel %vm54_vm9, 1.0, %v615_v9  ;;  %vm55_vm10 = vcmp.eq.s32.totalorder %v40_v38, %v652_v3  ;;  %vm56_vm11 = vcmp.eq.s32.totalorder %v41_v40, %v652_v3  ;;  %vm113_vm14 = vcmask 662528   ;;  %p596_p3 = por %p595_p2, %p594_p1 }
   0xe   :  { %v459_v41 = vsel %vm55_vm10, 1.0, %v615_v9  ;;  %v460_v43 = vsel %vm56_vm11, 1.0, %v615_v9  ;;  %vm57_vm12 = vcmp.eq.s32.totalorder %v42_v42, %v652_v3  ;;  %vm58_vm13 = vcmp.eq.s32.totalorder %v43_v44, %v652_v3 }
   0xf   :  { %83 = vxpose.xlu0.b32.cont [3/11] (short) (narrow) %v454_v21, 8  ;;  %529 = vmatmul.mubr.msk.f32.vlgmr.msra.gmra.mrb[0].mxu1 %vm192_vm6, %v191_v30  ;;  %v461_v45 = vsel %vm57_vm12, 1.0, %v615_v9  ;;  %v462_v46 = vsel %vm58_vm13, 1.0, %v615_v9  ;;  %vm424_vm15 = vcmask 7168   ;;  %p597_p4 = pnand %p596_p3, %p590_p0 }
  0x10   :  { %564 = vmatpush3.bf16.msra.mxu0 %v563_v22  ;;  %573 = vmatpush3.bf16.msra.mxu1 %v616_v26 }
  0x11   :  { %565 = vmatprep.subr.bf16.mxu0 %v613_v4  ;;  %574 = vmatprep.subr.bf16.mxu1 %v613_v4 }
  0x12   :  { %539 = vmatprep.mubr.msk.f32.mxu1 %vm614_vm0, %v615_v9 }
  0x13   :  { %84 = vxpose.xlu0.b32.cont [4/11] (short) (narrow) %v455_v28, 8 }
  0x14   :  { %567 = vmatpush3.bf16.msra.mxu0 %v566_v29  ;;  %575 = vmatpush3.bf16.msra.mxu1 %v616_v26 }
  0x15   :  { %515 = vmatprep.subr.mxu0 %v615_v9  ;;  %576 = vmatprep.subr.bf16.mxu1 %v613_v4 }
  0x17   :  { %85 = vxpose.xlu0.b32.cont [5/11] (short) (narrow) %v456_v32, 8  ;;  %540 = vmatmul.mubr.msk.f32.vlgmr.msra.gmra.mrb[2].mxu1 %vm192_vm6, %v266_v37 }
  0x18   :  { %516 = vmatpush3.msk.msra.mxu0 %vm117_vm8, %v30_v34  ;;  %577 = vmatpush3.bf16.msra.mxu1 %v616_v26 }
  0x19   :  { %550 = vmatprep.mubr.msk.f32.mxu1 %vm614_vm0, %v615_v9  ;;  %578 = vmatprep.subr.bf16.mxu1 %v613_v4 }
  0x1b   :  { %86 = vxpose.xlu0.b32.cont [6/11] (short) (narrow) %v457_v36, 8 }
  0x1c   :  { %579 = vmatpush3.bf16.msra.mxu1 %v616_v26 }
  0x1f   :  { %87 = vxpose.xlu0.b32.cont [7/11] (short) (narrow) %v458_v39, 8 }
  0x23   :  { %88 = vxpose.xlu0.b32.cont [8/11] (short) (narrow) %v459_v41, 8 }
  0x27   :  { %89 = vxpose.xlu0.b32.cont [9/11] (short) (narrow) %v460_v43, 8 }
  0x2b   :  { %90 = vxpose.xlu0.b32.cont [10/11] (short) (narrow) %v461_v45, 8 }
  0x2f   :  { %91 = vxpose.xlu0.b32.end [11/11] (short) (narrow) %v462_v46, 8 }
  0x87   :  { %v97_v47 = vpop.trf.xlu0 }
  0x88   :  { %518 = vmatmul.mubr.msk.f32.vlgmr.msra.gmra.mrb[0].mxu0 %vm113_vm14, %v97_v47 }
  0xe2   :  { %v262_v48 = vpop.f32.mrb[0].mxu1 }
  0xe3   :  { %v530_v49 = vpop.f32.mrb[1].mxu1 }
  0xea   :  { %v336_v50 = vpop.f32.mrb[2].mxu1 }
  0xeb   :  { %v414_v51 = vmax.f32 %v262_v48, %v336_v50  ;;  %v541_v52 = vpop.f32.mrb[3].mxu1 }
  0xed   :  { %v415_v56 = vmax.f32 %v414_v51, 1e-30 }
  0xef   :  { %587 = vrsqrt.f32 %v415_v56 }
  0xf9   :  { %v588_v57 = vpop.eup %587 }
 0x15b   :  { %v187_v53 = vpop.f32.mrb[0].mxu0 }
 0x15c   :  { %v340_v54 = vmul.f32 %v187_v53, %v704_v27  ;;  %v519_v55 = vpop.f32.mrb[1].mxu0 }
 0x15e   :  { %551 = vmatmul.mubr.msk.f32.vlgmr.msra.gmra.mrb[4].mxu1 %vm192_vm6, %v340_v54 }
 0x231   :  { %v410_v58 = vpop.f32.mrb[4].mxu1 }
 0x232   :  { %v417_v59 = vmul.f32 %v588_v57, %v410_v58  ;;  %v552_v60 = vpop.f32.mrb[5].mxu1 }
 0x234   :  { %v418_v61 = vsub.f32 1.0, %v417_v59 }
 0x236   :  { %v425_v62 = vsel %vm424_vm15, %v418_v61, 0.0 }
 0x237   :  { %426 = vadd.xlane.f32.xlu1 %v425_v62 }
 0x2c4   :  { %v427_v63 = vpop.xlane.xlu1 %426 }
 0x2c5   :  { %v428_v0 = vrot.slane %v427_v63, 4 }
 0x2c7   :  { %v429_v1 = vadd.f32 %v428_v0, %v427_v63 }
 0x2c9   :  { %v430_v2 = vrot.slane %v429_v1, 2 }
 0x2cb   :  { %v431_v3 = vadd.f32 %v430_v2, %v429_v1 }
 0x2cd   :  { %v432_v4 = vrot.slane %v431_v3, 1 }
 0x2cf   :  { %v433_v5 = vadd.f32 %v432_v4, %v431_v3 }
 0x2d1   :  { %580 = vpush %v433_v5 }
 0x302   :  { %s581_s15 = spop %580 }
 0x303   :  { %v435_v6 = vstv %s581_s15 }
 0x304   :  { %436 = vst [vmem:[#allocation2] sm:$0xff] %v435_v6 }
 0x305   :  { %600 = shalt.err (!%p597_p4)
}
 0x306   :  { %s601_s19 = scalar_lea.hbm %s766_s4, 128 }
 0x307   :  { %p602_p5 = scmp.ne.s32.totalorder %s766_s4, %s601_s19  ;;  %p605_p6 = scmp.lt.u32.totalorder %s601_s19, %s766_s4 }
 0x309   :  { %p607_p7 = pnand %p605_p6, %p602_p5 }
 0x30b   :  { %610 = shalt.err (!%p607_p7)
}
 0x30c   :  { %446 = dma.vmem_to_hbm [thread:$0]  %s444_s3, 128, %s766_s4, [#allocation3]  }
 0x30d   :  { %611 = dma.done.wait [#allocation3], 128  }
 0x30e   :  { %612 = vsyncadd [#allocation3], 4294967168 }
 0x30f   :  { %450 = vsyncpa [#allocation3], 1 }

</bundles_post_ra>
